<compile_context>
chip_gen: v5e
topology: v5e:2x2
jax: 0.10.0
libtpu: 0.0.40
codegen_flags: <defaults>
</compile_context>

<pallas_src>
import functools

import jax
import jax.numpy as jnp
from jax.experimental import pallas as pl
from jax.experimental.pallas import tpu as pltpu


def _round_up(v, m):
    return (v + m - 1) // m * m


def _mdn_fused_kernel(x_ref, w_ref, b_ref, out_ref, *, G, GO):
    x = x_ref[...]                                           # [tb, D]
    # Single fused matmul for all three heads (f32 accumulate on MXU).
    y = jnp.dot(x, w_ref[...], preferred_element_type=jnp.float32)
    y = y + b_ref[...]                                       # [tb, N_pad]

    n_pad = y.shape[-1]
    # Column masks at (1, N_pad); jnp.where broadcasts them against y, so no
    # full (tb, N_pad) iota / bool temps are materialized.
    col = jax.lax.broadcasted_iota(jnp.int32, (1, n_pad), 1)
    pi_mask = col < G                                        # (1, N_pad)
    sig_mask = (col >= G) & (col < G + GO)                   # (1, N_pad)

    # Numerically stable softmax over the pi columns only; sigma columns
    # reuse the same exp pass with zero shift.
    neg_inf = jnp.float32(-jnp.inf)
    m = jnp.max(jnp.where(pi_mask, y, neg_inf), axis=-1, keepdims=True)
    shift = jnp.where(pi_mask, m, jnp.float32(0.0))          # [tb, N_pad]
    e = jnp.exp(y - shift)                                   # EUP, full slab
    denom = jnp.sum(jnp.where(pi_mask, e, jnp.float32(0.0)),
                    axis=-1, keepdims=True)
    inv = pl.reciprocal(denom, approx=False)                 # exact, (tb,1)

    # pi columns -> softmax, sigma columns -> exp, mu + pad columns -> y
    # (pad columns of y are exactly 0 since W/b are zero-padded there).
    out = jnp.where(pi_mask, e * inv, jnp.where(sig_mask, e, y))
    out_ref[...] = out.astype(out_ref.dtype)


def fuse_mdn_params(params, num_gaussians, out_features):
    """Concatenate the three heads' weights once into a lane-dense slab."""
    G = num_gaussians
    GO = G * out_features
    N = G + 2 * GO
    N_pad = _round_up(N, 128)
    w_cat = jnp.concatenate(
        [params["w_pi"], params["w_sigma"], params["w_mu"]], axis=1)
    b_cat = jnp.concatenate(
        [params["b_pi"], params["b_sigma"], params["b_mu"]], axis=1)
    w_cat = jnp.pad(w_cat, ((0, 0), (0, N_pad - N)))
    b_cat = jnp.pad(b_cat, ((0, 0), (0, N_pad - N)))
    return {"w_cat": w_cat, "b_cat": b_cat}


def mdn_forward(x, fused, num_gaussians, out_features, *, tb=None):
    """x: [B, D] float32. fused: output of fuse_mdn_params."""
    B, D = x.shape
    G = num_gaussians
    O = out_features
    GO = G * O
    w_cat = fused["w_cat"]
    b_cat = fused["b_cat"]
    N_pad = w_cat.shape[1]

    # Batch tile:
    #  * big enough that per-step DMA dwarfs the ~0.35 us per-step overhead,
    #  * aims for ~4 grid steps on large batches (v7x shards "parallel" axes
    #    across its 2 TensorCores),
    #  * capped at 2048 rows so double-buffered blocks + matmul temps stay
    #    well inside v5e's 16 MiB default scoped-VMEM limit,
    #  * never larger than the (8-rounded) batch itself.
    if tb is None:
        tb = min(2048, max(256, _round_up(pl.cdiv(B, 4), 8)))
        tb = min(tb, _round_up(B, 8))
    tb = max(8, _round_up(tb, 8))

    # No wrapper-side padding of x: Pallas handles the ragged last block
    # (row-independent compute; out-of-range rows are never written back).
    grid = (pl.cdiv(B, tb),)

    kernel = functools.partial(_mdn_fused_kernel, G=G, GO=GO)

    cost = pl.CostEstimate(
        flops=2 * B * D * N_pad,
        transcendentals=B * N_pad,
        bytes_accessed=4 * (B * D + D * N_pad + N_pad + B * N_pad),
    )

    out = pl.pallas_call(
        kernel,
        grid=grid,
        in_specs=[
            pl.BlockSpec((tb, D), lambda i: (i, 0)),      # x tile
            pl.BlockSpec((D, N_pad), lambda i: (0, 0)),   # fused weights
            pl.BlockSpec((1, N_pad), lambda i: (0, 0)),   # fused bias
        ],
        out_specs=pl.BlockSpec((tb, N_pad), lambda i: (i, 0)),
        out_shape=jax.ShapeDtypeStruct((B, N_pad), jnp.float32),
        compiler_params=pltpu.CompilerParams(
            dimension_semantics=("parallel",)),
        cost_estimate=cost,
    )(x, w_cat, b_cat)

    # Wrapper-side layout glue only (matches torch .view(-1, G, O)).
    # TODO(synk): fuse the MDN NLL / sampling consumer to read the slab
    # directly and eliminate this slice pass entirely.
    pi = out[:, :G]
    sigma = out[:, G:G + GO].reshape(B, G, O)
    mu = out[:, G + GO:G + 2 * GO].reshape(B, G, O)
    return pi, sigma, mu


def init_mdn_params(key, in_features, out_features, num_gaussians):
    """Deterministic init mimicking nn.Linear (uniform +-1/sqrt(in_features)).
    Weights are stored transposed: [in_features, out_dim]."""
    D, O, G = in_features, out_features, num_gaussians
    bound = 1.0 / (D ** 0.5)
    ks = jax.random.split(key, 6)

    def u(k, shape):
        return jax.random.uniform(k, shape, jnp.float32, -bound, bound)

    return {
        "w_pi": u(ks[0], (D, G)),
        "b_pi": u(ks[1], (1, G)),
        "w_sigma": u(ks[2], (D, G * O)),
        "b_sigma": u(ks[3], (1, G * O)),
        "w_mu": u(ks[4], (D, G * O)),
        "b_mu": u(ks[5], (1, G * O)),
    }


def mdn_reference(x, params, num_gaussians, out_features):
    """Pure-JAX reference reproducing the PyTorch forward exactly."""
    B = x.shape[0]
    logits = x @ params["w_pi"] + params["b_pi"]
    pi = jax.nn.softmax(logits, axis=1)
    sigma = jnp.exp(x @ params["w_sigma"] + params["b_sigma"])
    sigma = sigma.reshape(B, num_gaussians, out_features)
    mu = (x @ params["w_mu"] + params["b_mu"]).reshape(
        B, num_gaussians, out_features)
    return pi, sigma, mu


if __name__ == "__main__":
    in_features = 32
    out_features = 8
    num_gaussians = 4

    key = jax.random.PRNGKey(0)
    kp, kx1, kx2, kx3 = jax.random.split(key, 4)
    params = init_mdn_params(kp, in_features, out_features, num_gaussians)
    fused = fuse_mdn_params(params, num_gaussians, out_features)

    def check(batch, kxi):
        x = jax.random.normal(kxi, (batch, in_features), jnp.float32)
        pi, sigma, mu = mdn_forward(x, fused, num_gaussians, out_features)
        jax.block_until_ready((pi, sigma, mu))
        pi_ref, sigma_ref, mu_ref = mdn_reference(
            x, params, num_gaussians, out_features)
        assert pi.shape == (batch, num_gaussians)
        assert sigma.shape == (batch, num_gaussians, out_features)
        assert mu.shape == (batch, num_gaussians, out_features)
        assert jnp.allclose(pi, pi_ref, atol=1e-4, rtol=1e-4)
        assert jnp.allclose(sigma, sigma_ref, atol=1e-4, rtol=1e-4)
        assert jnp.allclose(mu, mu_ref, atol=1e-4, rtol=1e-4)
        # pi must be a proper distribution (exact reciprocal in-kernel).
        assert jnp.allclose(pi.sum(axis=1), jnp.ones((batch,)), atol=1e-5)

    # Small smoke test (single grid step, tb == B).
    check(8, kx1)
    # B not a multiple of 8 -> ragged single block.
    check(10, kx2)
    # Multi-step grid with a ragged last block (B=272, tb=256 -> 2 steps).
    check(272, kx3)

    print("KERNEL_OK")
</pallas_src>

<mosaic_0001>
module attributes {stable_mosaic.version = 11 : i64} {
  func.func @_mdn_fused_kernel(%arg0: i32, %arg1: memref<8x32xf32, #tpu.memory_space<vmem>>, %arg2: memref<32x128xf32, #tpu.memory_space<vmem>>, %arg3: memref<1x128xf32, #tpu.memory_space<vmem>>, %arg4: memref<8x128xf32, #tpu.memory_space<vmem>>) attributes {dimension_semantics = [#tpu.dimension_semantics<parallel>], iteration_bounds = array<i64: 1>, scalar_prefetch = 0 : i64, scratch_operands = 0 : i64, tpu.core_type = #tpu.core_type<tc>, window_params = [{transform_indices = @transform_0, window_bounds = array<i64: 8, 32>}, {pipeline_mode = #tpu.pipeline_mode<synchronous>, transform_indices = @transform_1, window_bounds = array<i64: 32, 128>}, {pipeline_mode = #tpu.pipeline_mode<synchronous>, transform_indices = @transform_2, window_bounds = array<i64: 1, 128>}, {transform_indices = @transform_3, window_bounds = array<i64: 8, 128>}]} {
    %c0 = arith.constant 0 : index
    %c0_0 = arith.constant 0 : index
    %0 = vector.load %arg1[%c0, %c0_0] : memref<8x32xf32, #tpu.memory_space<vmem>>, vector<8x32xf32>
    %c0_1 = arith.constant 0 : index
    %c0_2 = arith.constant 0 : index
    %1 = vector.load %arg2[%c0_1, %c0_2] : memref<32x128xf32, #tpu.memory_space<vmem>>, vector<32x128xf32>
    %cst = arith.constant dense<0.000000e+00> : vector<8x128xf32>
    %2 = tpu.matmul %0, %1, %cst {dimension_numbers = #tpu.dot_dimension_numbers<[1], [0], [0], [1], [0, 0, 1, 1], [], []>} : vector<8x32xf32>, vector<32x128xf32>, vector<8x128xf32> -> vector<8x128xf32>
    %c0_3 = arith.constant 0 : index
    %c0_4 = arith.constant 0 : index
    %3 = vector.load %arg3[%c0_3, %c0_4] : memref<1x128xf32, #tpu.memory_space<vmem>>, vector<1x128xf32>
    %4 = vector.broadcast %3 : vector<1x128xf32> to vector<8x128xf32>
    %5 = arith.addf %2, %4 : vector<8x128xf32>
    %6 = tpu.iota {dimensions = array<i32: 1>} : vector<1x128xi32>
    %c4_i32 = arith.constant 4 : i32
    %7 = vector.broadcast %c4_i32 : i32 to vector<1x128xi32>
    %8 = arith.cmpi slt, %6, %7 : vector<1x128xi32>
    %c4_i32_5 = arith.constant 4 : i32
    %9 = vector.broadcast %c4_i32_5 : i32 to vector<1x128xi32>
    %10 = arith.cmpi sge, %6, %9 : vector<1x128xi32>
    %c36_i32 = arith.constant 36 : i32
    %11 = vector.broadcast %c36_i32 : i32 to vector<1x128xi32>
    %12 = arith.cmpi slt, %6, %11 : vector<1x128xi32>
    %13 = arith.andi %10, %12 : vector<1x128xi1>
    %cst_6 = arith.constant 0xFF800000 : f32
    %14 = vector.shape_cast %8 : vector<1x128xi1> to vector<1x128xi1>
    %15 = vector.broadcast %14 : vector<1x128xi1> to vector<8x128xi1>
    %16 = vector.broadcast %cst_6 : f32 to vector<8x128xf32>
    %17 = arith.select %15, %5, %16 : vector<8x128xi1>, vector<8x128xf32>
    %cst_7 = arith.constant dense<0xFF800000> : vector<8xf32>
    %18 = vector.multi_reduction <maximumf>, %17, %cst_7 [1] : vector<8x128xf32> to vector<8xf32>
    %19 = vector.shape_cast %18 : vector<8xf32> to vector<8x1xf32>
    %cst_8 = arith.constant 0.000000e+00 : f32
    %20 = vector.shape_cast %8 : vector<1x128xi1> to vector<1x128xi1>
    %21 = vector.broadcast %20 : vector<1x128xi1> to vector<8x128xi1>
    %22 = vector.shape_cast %19 : vector<8x1xf32> to vector<8x1xf32>
    %23 = vector.broadcast %22 : vector<8x1xf32> to vector<8x128xf32>
    %24 = vector.broadcast %cst_8 : f32 to vector<8x128xf32>
    %25 = arith.select %21, %23, %24 : vector<8x128xi1>, vector<8x128xf32>
    %26 = arith.subf %5, %25 : vector<8x128xf32>
    %27 = math.exp %26 : vector<8x128xf32>
    %cst_9 = arith.constant 0.000000e+00 : f32
    %28 = vector.shape_cast %8 : vector<1x128xi1> to vector<1x128xi1>
    %29 = vector.broadcast %28 : vector<1x128xi1> to vector<8x128xi1>
    %30 = vector.broadcast %cst_9 : f32 to vector<8x128xf32>
    %31 = arith.select %29, %27, %30 : vector<8x128xi1>, vector<8x128xf32>
    %cst_10 = arith.constant dense<0.000000e+00> : vector<8xf32>
    %32 = vector.multi_reduction <add>, %31, %cst_10 [1] : vector<8x128xf32> to vector<8xf32>
    %33 = vector.shape_cast %32 : vector<8xf32> to vector<8x1xf32>
    %34 = tpu.reciprocal %33 : vector<8x1xf32> -> vector<8x1xf32>
    %35 = vector.broadcast %34 : vector<8x1xf32> to vector<8x128xf32>
    %36 = arith.mulf %27, %35 : vector<8x128xf32>
    %37 = vector.shape_cast %13 : vector<1x128xi1> to vector<1x128xi1>
    %38 = vector.broadcast %37 : vector<1x128xi1> to vector<8x128xi1>
    %39 = arith.select %38, %27, %5 : vector<8x128xi1>, vector<8x128xf32>
    %40 = vector.shape_cast %8 : vector<1x128xi1> to vector<1x128xi1>
    %41 = vector.broadcast %40 : vector<1x128xi1> to vector<8x128xi1>
    %42 = arith.select %41, %36, %39 : vector<8x128xi1>, vector<8x128xf32>
    %c0_11 = arith.constant 0 : index
    %c0_12 = arith.constant 0 : index
    %43 = vector.load %arg4[%c0_11, %c0_12] : memref<8x128xf32, #tpu.memory_space<vmem>>, vector<8x128xf32>
    tpu.vector_store %arg4[%c0_11, %c0_12], %42 {strides = array<i32>} : memref<8x128xf32, #tpu.memory_space<vmem>>, vector<8x128xf32>,
    return
  }
  func.func @transform_0(%arg0: i32) -> (i32, i32) {
    %c0_i32 = arith.constant 0 : i32
    %c0_i32_0 = arith.constant 0 : i32
    return %arg0, %c0_i32 : i32, i32
  }
  func.func @transform_1(%arg0: i32) -> (i32, i32) {
    %c0_i32 = arith.constant 0 : i32
    %c0_i32_0 = arith.constant 0 : i32
    %c0_i32_1 = arith.constant 0 : i32
    return %c0_i32, %c0_i32_0 : i32, i32
  }
  func.func @transform_2(%arg0: i32) -> (i32, i32) {
    %c0_i32 = arith.constant 0 : i32
    %c0_i32_0 = arith.constant 0 : i32
    %c0_i32_1 = arith.constant 0 : i32
    return %c0_i32, %c0_i32_0 : i32, i32
  }
  func.func @transform_3(%arg0: i32) -> (i32, i32) {
    %c0_i32 = arith.constant 0 : i32
    %c0_i32_0 = arith.constant 0 : i32
    return %arg0, %c0_i32 : i32, i32
  }
}

</mosaic_0001>

<bundles_post_ra>
// kernel: tpu_custom_call.1
= control target key start
LH: loop header
LB: loop body
LE: loop exit
PB: predicated region body
PF: predicated region fallthrough
CT: control target
= control target key end

     0   :  { %8 = vsyncpa [#allocation3], 0  ;;  %s264_s0 = inlined_call_operand.hbm [shape: f32[8,32], index: 0, kind: input, shape index: {}]   ;;  %s265_s1 = inlined_call_operand.hbm [shape: f32[32,128], index: 1, kind: input, shape index: {}]   ;;  %s266_s2 = inlined_call_operand.vmem [shape: f32[1,128], index: 2, kind: input, shape index: {}]   ;;  %s267_s3 = inlined_call_operand.hbm [shape: f32[8,128], index: 3, kind: output, shape index: {}]  }
   0x1   :  { %9 = vsyncpa [#allocation6], 0 }
   0x2   :  { %10 = vsyncpa [#allocation4], 0  ;;  %s16_s14 = sshll.u32 %s264_s0, 4  ;;  %s223_s15 = smov [#allocation2]   ;;  %s17_s14 = int_to_ptr.hbm [resolvable:$true] %s16_s14 }
   0x3   :  { %s18_s16 = sshll.u32 %s223_s15, 4  ;;  %s26_s19 = sshll.u32 %s265_s1, 4  ;;  %s19_s16 = int_to_ptr.vmem [resolvable:$true] %s18_s16  ;;  %s27_s19 = int_to_ptr.hbm [resolvable:$true] %s26_s19 }
   0x4   :  { %21 = dma.hbm_to_vmem [thread:$0]  %s17_s14, 128, %s19_s16, [#allocation3]  }
   0x5   :  { %s224_s20 = smov [#allocation5]   ;;  %s225_s22 = smov 128  }
   0x6   :  { %s28_s21 = sshll.u32 %s224_s20, 4  ;;  %s226_s23 = smov 8   ;;  %s29_s21 = int_to_ptr.vmem [resolvable:$true] %s28_s21 }
   0x7   :  { %34 = dma.hbm_to_vmem [thread:$0]  %s27_s19, 512, %s29_s21, [#allocation6], %s225_s22, %s225_s22, %s226_s23  }
   0x8   :  { %217 = dma.done.wait [#allocation3], 128  }
   0x9   :  { %218 = vsyncadd [#allocation3], 4294967168 }
   0xa   :  { %219 = dma.done.wait [#allocation6], 512  }
   0xb   :  { %220 = vsyncadd [#allocation6], 4294966784  ;;  %v49_v0 = vld [vmem:[#allocation5 + $0x18] sm:$0xff]  ;;  %v48_v1 = vld [vmem:[#allocation5 + $0x10] sm:$0xff]  ;;  %vm54_vm0 = vcmask 261120   ;;  %v78_v5 = vlaneseq  ;;  %s123_s27 = sshll.u32 %s267_s3, 4  ;;  %s124_s27 = int_to_ptr.hbm [resolvable:$true] %s123_s27 }
   0xc   :  { %70 = vmatpush.msra.mxu0 %v49_v0  ;;  %v47_v2 = vld [vmem:[#allocation5 + $0x8] sm:$0xff]  ;;  %v46_v3 = vld [vmem:[#allocation5] sm:$0xff]  ;;  %v45_v4 = vld [vmem:[#allocation2] sm:$0xff] }
   0xd   :  { %v79_v6 = vand.u32 127, %v78_v5  ;;  %v140_v7 = vld [vmem:[%s266_s2] ss:$0 sm:$0xff]  ;;  %s227_s2 = smov [#allocation7]  }
   0xe   :  { %71 = vmatpush.msra.mxu0 %v48_v1  ;;  %s121_s24 = sshll.u32 %s227_s2, 4  ;;  %s122_s24 = int_to_ptr.vmem [resolvable:$true] %s121_s24 }
   0xf   :  { %vm80_vm1 = vcmp.lt.s32.totalorder %v79_v6, 4  ;;  %vm81_vm3 = vcmp.ge.s32.totalorder %v79_v6, 4  ;;  %vm82_vm4 = vcmp.lt.s32.totalorder %v79_v6, 36 }
  0x10   :  { %72 = vmatpush.msra.mxu0 %v47_v2  ;;  %vm83_vm8 = vmand %vm81_vm3, %vm82_vm4 }
  0x12   :  { %73 = vmatpush.msra.mxu0 %v46_v3 }
  0x13   :  { %134 = vmatmul.msk.f32.vlgmr.msra.gmra.mxu0 %vm54_vm0, %v45_v4 }
  0x90   :  { %v75_v8 = vpop.f32.mrf.mxu0 }
  0x91   :  { %v76_v9 = vadd.f32 %v140_v7, %v75_v8 }
  0x93   :  { %v86_v10 = vsel %vm80_vm1, %v76_v9, -inf }
  0x94   :  { %87 = vmax.xlane.f32.xlu0 %v86_v10 }
 0x107   :  { %v88_v11 = vpop.xlane.xlu0 %87 }
 0x108   :  { %v89_v12 = vsel %vm80_vm1, %v88_v11, 0.0 }
 0x109   :  { %v90_v13 = vsub.f32 %v76_v9, %v89_v12 }
 0x10b   :  { %v91_v14 = vmul.f32 1.442695, %v90_v13 }
 0x10d   :  { %141 = vpow2.f32 %v91_v14 }
 0x113   :  { %v142_v15 = vpop.eup %141 }
 0x114   :  { %v93_v16 = vsel %vm80_vm1, %v142_v15, 0.0  ;;  %v113_v29 = vsel %vm83_vm8, %v142_v15, %v76_v9 }
 0x115   :  { %94 = vadd.xlane.f32.xlu0 %v93_v16 }
 0x188   :  { %v95_v17 = vpop.xlane.xlu0 %94 }
 0x189   :  { %143 = vrcp.f32 %v95_v17  ;;  %v107_v21 = vand.u32 2147483648, %v95_v17  ;;  %v105_v23 = vand.u32 2147483647, %v95_v17  ;;  %vm101_vm5 = vweird.f32 %v95_v17 }
 0x18b   :  { %v108_v25 = vor.u32 1.1754944e-38, %v107_v21  ;;  %vm106_vm7 = vcmp.eq.f32.partialorder %v105_v23, 8.507059e+37 }
 0x18f   :  { %v144_v18 = vpop.eup %143 }
 0x190   :  { %v97_v19 = vmul.f32 %v144_v18, %v95_v17  ;;  %vm102_vm2 = vweird.f32 %v144_v18 }
 0x191   :  { %vm103_vm6 = vmor %vm101_vm5, %vm102_vm2 }
 0x192   :  { %v98_v20 = vsub.f32 1.0, %v97_v19 }
 0x194   :  { %v99_v22 = vmul.f32 %v144_v18, %v98_v20 }
 0x196   :  { %v100_v24 = vadd.f32 %v144_v18, %v99_v22 }
 0x198   :  { %v104_v26 = vsel %vm103_vm6, %v144_v18, %v100_v24 }
 0x199   :  { %v109_v27 = vsel %vm106_vm7, %v108_v25, %v104_v26 }
 0x19a   :  { %v110_v28 = vmul.f32 %v142_v15, %v109_v27 }
 0x19c   :  { %v114_v30 = vsel %vm80_vm1, %v110_v28, %v113_v29 }
 0x19d   :  { %115 = vst [vmem:[#allocation7] sm:$0xff] %v114_v30 }
 0x19e   :  { %126 = dma.vmem_to_hbm [thread:$0]  %s122_s24, 128, %s124_s27, [#allocation4]  }
 0x19f   :  { %221 = dma.done.wait [#allocation4], 128  }
 0x1a0   :  { %222 = vsyncadd [#allocation4], 4294967168 }
 0x1a1   :  { %131 = vsyncpa [#allocation3], 1 }
 0x1a2   :  { %132 = vsyncpa [#allocation6], 1 }
 0x1a3   :  { %133 = vsyncpa [#allocation4], 1 }

</bundles_post_ra>
